<compile_context>
chip_gen: v6e
topology: v6e:2x2x1
jax: 0.10.0
libtpu: 0.0.40
codegen_flags: <defaults>
</compile_context>

<pallas_src>
import functools
import math

import jax
import jax.numpy as jnp
from jax.experimental import pallas as pl
from jax.experimental.pallas import tpu as pltpu


# 32 MiB scoped VMEM: safe on v5e/v6e (128 MiB physical) and v7x (64 MiB physical),
# and raises v5e's 16 MiB default so the bigger tiles below actually compile.
_VMEM_LIMIT = 32 * 1024 * 1024


def _compiler_params():
    return pltpu.CompilerParams(
        dimension_semantics=("parallel",),
        vmem_limit_bytes=_VMEM_LIMIT,
    )


# ----------------------------------------------------------------------------
# LayerNormalization kernel (the reviewed kernel, improved per feedback)
# ----------------------------------------------------------------------------
def _layernorm_kernel(alpha_ref, bias_ref, x_ref, o_ref, *, eps: float):
    # x_ref: (ROW_TILE, H) tile in VMEM; alpha_ref/bias_ref: (1,) scalars in SMEM.
    x = x_ref[...].astype(jnp.float32)
    h = x.shape[-1]
    mean = jnp.sum(x, axis=-1, keepdims=True) * jnp.float32(1.0 / h)
    d = x - mean
    # torch.std default = unbiased (ddof=1). Keep the two-pass form (not E[x^2]-mean^2)
    # to avoid catastrophic cancellation; d is reused for the output.
    var = jnp.sum(d * d, axis=-1, keepdims=True) * jnp.float32(1.0 / (h - 1))
    std = jnp.sqrt(var)
    # Per-row reciprocal on the EUP; approx=False keeps the 1e-5 tolerance.
    inv = pl.reciprocal(std + jnp.float32(eps), approx=False)        # (ROW_TILE, 1)
    scale = alpha_ref[0].astype(jnp.float32) * inv
    bias = bias_ref[0].astype(jnp.float32)
    o_ref[...] = (d * scale + bias).astype(o_ref.dtype)


def _ln_row_tile(rows: int, h: int, max_tile: int = 2048) -> int:
    """Largest row tile that keeps double-buffered in+out f32 tiles under ~16 MiB
    (safe under v7x's 32 MiB default scoped VMEM), is a multiple of 16 (bf16 sublane
    packing), and leaves >= 4 grid steps when there is enough work (megacore / 2 TCs)."""
    budget_bytes = 16 * 1024 * 1024
    bytes_per_row = h * 4 * 4                 # (2 input + 2 output buffers) x f32
    cap = max(8, budget_bytes // bytes_per_row)
    tile = min(max_tile, cap, rows)
    if tile >= 16:
        tile = (tile // 16) * 16
    while tile > 16 and pl.cdiv(rows, tile) < 4 and rows > 4 * 16:
        tile = max(16, ((tile // 2) // 16) * 16)
    return max(1, tile)


def layer_normalization(x, alpha, bias, eps: float = 1e-6):
    """PyTorch LayerNormalization: alpha * (x - mean) / (std + eps) + bias,
    mean/std (unbiased, ddof=1) over the last dim; scalar alpha/bias."""
    orig_shape = x.shape
    h = orig_shape[-1]
    rows = 1
    for s in orig_shape[:-1]:
        rows *= s
    x2 = x.reshape(rows, h)

    row_tile = _ln_row_tile(rows, h)
    grid = (pl.cdiv(rows, row_tile),)          # partial final tile handled by Pallas masking

    out2 = pl.pallas_call(
        functools.partial(_layernorm_kernel, eps=eps),
        out_shape=jax.ShapeDtypeStruct((rows, h), x.dtype),
        grid_spec=pl.GridSpec(
            grid=grid,
            in_specs=[
                pl.BlockSpec(memory_space=pltpu.SMEM),    # alpha (1,)
                pl.BlockSpec(memory_space=pltpu.SMEM),    # bias  (1,)
                pl.BlockSpec((row_tile, h), lambda i: (i, 0)),
            ],
            out_specs=pl.BlockSpec((row_tile, h), lambda i: (i, 0)),
        ),
        compiler_params=_compiler_params(),
        cost_estimate=pl.CostEstimate(
            flops=6 * rows * h,
            transcendentals=2 * rows,
            bytes_accessed=2 * rows * h * x.dtype.itemsize,
        ),
    )(alpha, bias, x2)

    return out2.reshape(orig_shape)


# ----------------------------------------------------------------------------
# Linear (x @ W + b), optional ReLU, optional fused residual add
# ----------------------------------------------------------------------------
def _row_tile(rows: int, cap: int = 512) -> int:
    if rows <= cap:
        return rows                            # full-extent block is always layout-legal
    return max(8, (cap // 8) * 8)


def _linear_kernel(*refs, activation, has_residual):
    if has_residual:
        x_ref, w_ref, b_ref, r_ref, o_ref = refs
    else:
        x_ref, w_ref, b_ref, o_ref = refs
        r_ref = None
    x = x_ref[...].astype(jnp.float32)
    w = w_ref[...].astype(jnp.float32)
    y = jnp.dot(x, w, preferred_element_type=jnp.float32) + b_ref[...].astype(jnp.float32)
    if activation == "relu":
        y = jnp.maximum(y, 0.0)
    if r_ref is not None:
        y = y + r_ref[...].astype(jnp.float32)
    o_ref[...] = y.astype(o_ref.dtype)


def linear(x2, w, b, *, residual=None, activation=None):
    """y = x2 @ w + b. x2: (R, d_in), w: (d_in, d_out), b: (d_out,)."""
    R, d_in = x2.shape
    d_out = w.shape[1]
    tile = _row_tile(R)
    grid = (pl.cdiv(R, tile),)

    in_specs = [
        pl.BlockSpec((tile, d_in), lambda i: (i, 0)),
        pl.BlockSpec((d_in, d_out), lambda i: (0, 0)),
        pl.BlockSpec((1, d_out), lambda i: (0, 0)),
    ]
    args = [x2, w, b.reshape(1, d_out)]
    if residual is not None:
        in_specs.append(pl.BlockSpec((tile, d_out), lambda i: (i, 0)))
        args.append(residual)

    return pl.pallas_call(
        functools.partial(_linear_kernel, activation=activation,
                          has_residual=residual is not None),
        out_shape=jax.ShapeDtypeStruct((R, d_out), x2.dtype),
        grid_spec=pl.GridSpec(
            grid=grid,
            in_specs=in_specs,
            out_specs=pl.BlockSpec((tile, d_out), lambda i: (i, 0)),
        ),
        compiler_params=_compiler_params(),
    )(*args)


# ----------------------------------------------------------------------------
# FeedForwardBlock: fused linear1 -> ReLU -> (dropout=identity) -> linear2 (+ residual)
# ----------------------------------------------------------------------------
def _ffn_kernel(x_ref, w1_ref, b1_ref, w2_ref, b2_ref, r_ref, o_ref):
    x = x_ref[...].astype(jnp.float32)
    h = jnp.dot(x, w1_ref[...].astype(jnp.float32),
                preferred_element_type=jnp.float32) + b1_ref[...].astype(jnp.float32)
    h = jnp.maximum(h, 0.0)                     # ReLU; dropout is identity (eval / p=0)
    y = jnp.dot(h, w2_ref[...].astype(jnp.float32),
                preferred_element_type=jnp.float32) + b2_ref[...].astype(jnp.float32)
    o_ref[...] = (y + r_ref[...].astype(jnp.float32)).astype(o_ref.dtype)


def feed_forward(x2, w1, b1, w2, b2, residual):
    R, d_model = x2.shape
    d_ff = w1.shape[1]
    tile = _row_tile(R)
    grid = (pl.cdiv(R, tile),)
    return pl.pallas_call(
        _ffn_kernel,
        out_shape=jax.ShapeDtypeStruct((R, d_model), x2.dtype),
        grid_spec=pl.GridSpec(
            grid=grid,
            in_specs=[
                pl.BlockSpec((tile, d_model), lambda i: (i, 0)),
                pl.BlockSpec((d_model, d_ff), lambda i: (0, 0)),
                pl.BlockSpec((1, d_ff), lambda i: (0, 0)),
                pl.BlockSpec((d_ff, d_model), lambda i: (0, 0)),
                pl.BlockSpec((1, d_model), lambda i: (0, 0)),
                pl.BlockSpec((tile, d_model), lambda i: (i, 0)),
            ],
            out_specs=pl.BlockSpec((tile, d_model), lambda i: (i, 0)),
        ),
        compiler_params=_compiler_params(),
    )(x2, w1, b1.reshape(1, d_ff), w2, b2.reshape(1, d_model), residual)


# ----------------------------------------------------------------------------
# MultiHeadAttention: per-batch fused scaled-dot-product attention over all heads
# ----------------------------------------------------------------------------
def _mha_kernel(q_ref, k_ref, v_ref, m_ref, o_ref, *, scale):
    q = q_ref[0].astype(jnp.float32)            # (H, S, dk)
    k = k_ref[0].astype(jnp.float32)
    v = v_ref[0].astype(jnp.float32)
    m = m_ref[0]                                # (S, S)
    s = jnp.einsum("hqd,hkd->hqk", q, k,
                   preferred_element_type=jnp.float32) * jnp.float32(scale)
    s = jnp.where(m[None, :, :] == 0, jnp.float32(-1e9), s)
    s = s - jnp.max(s, axis=-1, keepdims=True)
    e = jnp.exp(s)
    p = e * pl.reciprocal(jnp.sum(e, axis=-1, keepdims=True), approx=False)
    # Attention dropout is identity (eval / p=0).
    o_ref[0] = jnp.einsum("hqk,hkd->hqd", p, v,
                          preferred_element_type=jnp.float32).astype(o_ref.dtype)


def multi_head_attention(q, k, v, mask_b):
    """q, k, v: (B, H, S, dk); mask_b: (B, S, S). Returns (B, H, S, dk)."""
    B, H, S, dk = q.shape
    qkv_spec = pl.BlockSpec((1, H, S, dk), lambda b: (b, 0, 0, 0))
    return pl.pallas_call(
        functools.partial(_mha_kernel, scale=1.0 / math.sqrt(dk)),
        out_shape=jax.ShapeDtypeStruct((B, H, S, dk), q.dtype),
        grid_spec=pl.GridSpec(
            grid=(B,),
            in_specs=[qkv_spec, qkv_spec, qkv_spec,
                      pl.BlockSpec((1, S, S), lambda b: (b, 0, 0))],
            out_specs=qkv_spec,
        ),
        compiler_params=_compiler_params(),
    )(q, k, v, mask_b)


# ----------------------------------------------------------------------------
# Encoder forward (Pallas-backed)
# ----------------------------------------------------------------------------
def encoder_forward(x, src_mask, params, num_heads):
    """Encoder.forward: pre-norm residual blocks of self-attention + FFN, final LayerNorm.
    Dropout is identity (eval mode / p=0)."""
    B, S, D = x.shape
    dk = D // num_heads
    mask_b = jnp.broadcast_to(src_mask, (B, 1, S, S)).reshape(B, S, S).astype(jnp.float32)

    def split_heads(t2):                         # (B*S, D) -> (B, H, S, dk)
        return t2.reshape(B, S, num_heads, dk).transpose(0, 2, 1, 3)

    for p in params["blocks"]:
        # residual 1: x = x + SelfAttention(norm(x))
        n1 = layer_normalization(x, p["ln1_a"], p["ln1_b"]).reshape(B * S, D)
        q = split_heads(linear(n1, p["wq"], p["bq"]))
        k = split_heads(linear(n1, p["wk"], p["bk"]))
        v = split_heads(linear(n1, p["wv"], p["bv"]))
        ctx = multi_head_attention(q, k, v, mask_b)
        ctx2 = ctx.transpose(0, 2, 1, 3).reshape(B * S, D)
        x = linear(ctx2, p["wo"], p["bo"], residual=x.reshape(B * S, D)).reshape(B, S, D)
        # residual 2: x = x + FeedForward(norm(x))
        n2 = layer_normalization(x, p["ln2_a"], p["ln2_b"]).reshape(B * S, D)
        x = feed_forward(n2, p["w1"], p["b1"], p["w2"], p["b2"],
                         residual=x.reshape(B * S, D)).reshape(B, S, D)
    return layer_normalization(x, params["final_ln_a"], params["final_ln_b"])


# ----------------------------------------------------------------------------
# Pure-JAX reference (same semantics as the PyTorch module, dropout in eval mode)
# ----------------------------------------------------------------------------
def _ref_layernorm(x, alpha, bias, eps=1e-6):
    mean = jnp.mean(x, axis=-1, keepdims=True)
    std = jnp.std(x, axis=-1, keepdims=True, ddof=1)
    return alpha[0] * (x - mean) / (std + eps) + bias[0]


def _ref_encoder(x, src_mask, params, num_heads):
    hi = jax.lax.Precision.HIGHEST

    def lin(z, w, b):
        return jnp.dot(z, w, precision=hi) + b

    B, S, D = x.shape
    dk = D // num_heads

    def split_heads(t):
        return t.reshape(B, S, num_heads, dk).transpose(0, 2, 1, 3)

    for p in params["blocks"]:
        n1 = _ref_layernorm(x, p["ln1_a"], p["ln1_b"])
        qh = split_heads(lin(n1, p["wq"], p["bq"]))
        kh = split_heads(lin(n1, p["wk"], p["bk"]))
        vh = split_heads(lin(n1, p["wv"], p["bv"]))
        scores = jnp.einsum("bhqd,bhkd->bhqk", qh, kh, precision=hi) / math.sqrt(dk)
        scores = jnp.where(src_mask == 0, -1e9, scores)
        attn = jax.nn.softmax(scores, axis=-1)
        ctx = jnp.einsum("bhqk,bhkd->bhqd", attn, vh, precision=hi)
        ctx = ctx.transpose(0, 2, 1, 3).reshape(B, S, D)
        x = x + lin(ctx, p["wo"], p["bo"])
        n2 = _ref_layernorm(x, p["ln2_a"], p["ln2_b"])
        x = x + lin(jnp.maximum(lin(n2, p["w1"], p["b1"]), 0.0), p["w2"], p["b2"])
    return _ref_layernorm(x, params["final_ln_a"], params["final_ln_b"])


def init_params(key, d_model, d_ff, n_blocks, dtype=jnp.float32):
    def dense(k, di, do):
        kw, kb = jax.random.split(k)
        w = jax.random.normal(kw, (di, do), dtype) * (1.0 / math.sqrt(di))
        b = jax.random.normal(kb, (do,), dtype) * 0.02
        return w, b

    blocks = []
    for _ in range(n_blocks):
        key, k1, k2, k3, k4, k5, k6 = jax.random.split(key, 7)
        wq, bq = dense(k1, d_model, d_model)
        wk, bk = dense(k2, d_model, d_model)
        wv, bv = dense(k3, d_model, d_model)
        wo, bo = dense(k4, d_model, d_model)
        w1, b1 = dense(k5, d_model, d_ff)
        w2, b2 = dense(k6, d_ff, d_model)
        blocks.append(dict(
            wq=wq, bq=bq, wk=wk, bk=bk, wv=wv, bv=bv, wo=wo, bo=bo,
            w1=w1, b1=b1, w2=w2, b2=b2,
            ln1_a=jnp.ones((1,), dtype), ln1_b=jnp.zeros((1,), dtype),
            ln2_a=jnp.ones((1,), dtype), ln2_b=jnp.zeros((1,), dtype),
        ))
    return dict(blocks=blocks,
                final_ln_a=jnp.ones((1,), dtype),
                final_ln_b=jnp.zeros((1,), dtype))


if __name__ == "__main__":
    key = jax.random.PRNGKey(0)

    # --- standalone LayerNorm kernel check (rows not divisible -> exercises cdiv grid) ---
    kx, key = jax.random.split(key)
    x_ln = jax.random.normal(kx, (2, 100, 128), dtype=jnp.float32)
    a1 = jnp.ones((1,), jnp.float32)
    b1 = jnp.zeros((1,), jnp.float32)
    out_ln = jax.block_until_ready(layer_normalization(x_ln, a1, b1, eps=1e-6))
    ref_ln = _ref_layernorm(x_ln, a1, b1, eps=1e-6)
    assert jnp.allclose(out_ln, ref_ln, atol=1e-5, rtol=1e-5), "LayerNorm kernel mismatch"

    # --- full Encoder forward ---
    B, S, d_model, num_heads, d_ff, n_blocks = 2, 8, 32, 4, 64, 2
    kx, kp, key = jax.random.split(key, 3)
    x = jax.random.normal(kx, (B, S, d_model), dtype=jnp.float32)
    src_mask = jnp.ones((B, 1, 1, S), dtype=jnp.float32)
    src_mask = src_mask.at[1, 0, 0, S - 2:].set(0.0)     # mask last two keys of batch 1
    params = init_params(kp, d_model, d_ff, n_blocks)

    # TODO(synk): dropout is treated as identity (eval mode / p=0); stochastic dropout
    # would need pltpu.prng_* plumbing and has no deterministic PyTorch-matching form.
    out = jax.block_until_ready(encoder_forward(x, src_mask, params, num_heads))
    ref = _ref_encoder(x, src_mask, params, num_heads)
    assert out.shape == (B, S, d_model)
    assert jnp.allclose(out, ref, atol=2e-2, rtol=2e-2), "Encoder output mismatch vs reference"

    print("KERNEL_OK")
</pallas_src>

<mosaic_0001>
module attributes {stable_mosaic.version = 11 : i64} {
  func.func @_layernorm_kernel(%arg0: i32, %arg1: memref<1xf32, #tpu.memory_space<smem>>, %arg2: memref<1xf32, #tpu.memory_space<smem>>, %arg3: memref<48x128xf32, #tpu.memory_space<vmem>>, %arg4: memref<48x128xf32, #tpu.memory_space<vmem>>) attributes {dimension_semantics = [#tpu.dimension_semantics<parallel>], iteration_bounds = array<i64: 5>, scalar_prefetch = 0 : i64, scratch_operands = 0 : i64, tpu.core_type = #tpu.core_type<tc>, window_params = [{transform_indices = @transform_0, window_bounds = array<i64: 1>}, {transform_indices = @transform_1, window_bounds = array<i64: 1>}, {transform_indices = @transform_2, window_bounds = array<i64: 48, 128>}, {transform_indices = @transform_3, window_bounds = array<i64: 48, 128>}]} {
    %c0 = arith.constant 0 : index
    %c0_0 = arith.constant 0 : index
    %0 = vector.load %arg3[%c0, %c0_0] : memref<48x128xf32, #tpu.memory_space<vmem>>, vector<48x128xf32>
    %cst = arith.constant dense<0.000000e+00> : vector<48xf32>
    %1 = vector.multi_reduction <add>, %0, %cst [1] : vector<48x128xf32> to vector<48xf32>
    %2 = vector.shape_cast %1 : vector<48xf32> to vector<48x1xf32>
    %cst_1 = arith.constant 7.812500e-03 : f32
    %3 = vector.broadcast %cst_1 : f32 to vector<48x1xf32>
    %4 = arith.mulf %2, %3 : vector<48x1xf32>
    %5 = vector.broadcast %4 : vector<48x1xf32> to vector<48x128xf32>
    %6 = arith.subf %0, %5 : vector<48x128xf32>
    %7 = arith.mulf %6, %6 : vector<48x128xf32>
    %cst_2 = arith.constant dense<0.000000e+00> : vector<48xf32>
    %8 = vector.multi_reduction <add>, %7, %cst_2 [1] : vector<48x128xf32> to vector<48xf32>
    %9 = vector.shape_cast %8 : vector<48xf32> to vector<48x1xf32>
    %cst_3 = arith.constant 0.00787401571 : f32
    %10 = vector.broadcast %cst_3 : f32 to vector<48x1xf32>
    %11 = arith.mulf %9, %10 : vector<48x1xf32>
    %12 = math.sqrt %11 : vector<48x1xf32>
    %cst_4 = arith.constant 9.99999997E-7 : f32
    %13 = vector.broadcast %cst_4 : f32 to vector<48x1xf32>
    %14 = arith.addf %12, %13 : vector<48x1xf32>
    %15 = tpu.reciprocal %14 : vector<48x1xf32> -> vector<48x1xf32>
    %c0_5 = arith.constant 0 : index
    %16 = memref.load %arg1[%c0_5] : memref<1xf32, #tpu.memory_space<smem>>
    %17 = vector.broadcast %16 : f32 to vector<48x1xf32>
    %18 = arith.mulf %17, %15 : vector<48x1xf32>
    %c0_6 = arith.constant 0 : index
    %19 = memref.load %arg2[%c0_6] : memref<1xf32, #tpu.memory_space<smem>>
    %20 = vector.broadcast %18 : vector<48x1xf32> to vector<48x128xf32>
    %21 = arith.mulf %6, %20 : vector<48x128xf32>
    %22 = vector.broadcast %19 : f32 to vector<48x128xf32>
    %23 = arith.addf %21, %22 : vector<48x128xf32>
    %c0_7 = arith.constant 0 : index
    %c0_8 = arith.constant 0 : index
    %24 = vector.load %arg4[%c0_7, %c0_8] : memref<48x128xf32, #tpu.memory_space<vmem>>, vector<48x128xf32>
    tpu.vector_store %arg4[%c0_7, %c0_8], %23 {strides = array<i32>} : memref<48x128xf32, #tpu.memory_space<vmem>>, vector<48x128xf32>,
    return
  }
  func.func @transform_0(%arg0: i32) -> i32 {
    %c0_i32 = arith.constant 0 : i32
    %c0_i32_0 = arith.constant 0 : i32
    return %c0_i32 : i32
  }
  func.func @transform_1(%arg0: i32) -> i32 {
    %c0_i32 = arith.constant 0 : i32
    %c0_i32_0 = arith.constant 0 : i32
    return %c0_i32 : i32
  }
  func.func @transform_2(%arg0: i32) -> (i32, i32) {
    %c0_i32 = arith.constant 0 : i32
    %c0_i32_0 = arith.constant 0 : i32
    return %arg0, %c0_i32 : i32, i32
  }
  func.func @transform_3(%arg0: i32) -> (i32, i32) {
    %c0_i32 = arith.constant 0 : i32
    %c0_i32_0 = arith.constant 0 : i32
    return %arg0, %c0_i32 : i32, i32
  }
}

</mosaic_0001>

<bundles_post_ra>
// kernel: tpu_custom_call.1
= control target key start
LH: loop header
LB: loop body
LE: loop exit
PB: predicated region body
PF: predicated region fallthrough
CT: control target
= control target key end

     0   :  { %s855_s0 = inlined_call_operand.<no memory space> [shape: f32[1], index: 0, kind: input, shape index: {}]   ;;  %s856_s1 = inlined_call_operand.<no memory space> [shape: f32[1], index: 1, kind: input, shape index: {}]   ;;  %s857_s2 = inlined_call_operand.hbm [shape: f32[200,128], index: 2, kind: input, shape index: {}]   ;;  %s858_s3 = inlined_call_operand.hbm [shape: f32[200,128], index: 3, kind: output, shape index: {}]  }
   0x1   :  { %8 = sst [smem:[#allocation2]] %s855_s0 }
   0x2   :  { %9 = sst [smem:[#allocation3]] %s856_s1 }
   0x3   :  { %10 = vsyncpa [#allocation5], 0 }
   0x4   :  { %12 = vsyncpa [#allocation5 + $0x1], 0 }
   0x5   :  { %13 = vsyncpa [#allocation6], 0 }
   0x6   :  { %15 = vsyncpa [#allocation6 + $0x1], 0  ;;  %s647_s16 = smov 0   ;;  %s649_s17 = smov 0  }
   0x7   :  { %s651_s18 = smov 0   ;;  %s653_s19 = smov 0  }
   0x8 LB: > { %s668_s0 = sadd.s32 4294967295, %s613_s19   ;;  %s436_s1 = sadd.s32 4294967294, %s613_s19   ;;  %s613_s19 = sphi %s653_s19, %s866_s19   ;;  %s609_s18 = sphi %s651_s18, %s865_s18   ;;  %s605_s17 = sphi %s649_s17, %s864_s17   ;;  %s601_s16 = sphi %s647_s16, %s863_s16  }
   0x9   : > { %s672_s20 = sadd.s32 1, %s613_s19   ;;  %s70_s21 = sadd.s32 1, %s609_s18 }
   0xa   : > { %s67_s22 = ssub.s32 %s613_s19, %s672_s20  ;;  %p77_p0 = scmp.ne.s32.totalorder %s609_s18, %s605_s17 }
   0xb   : > { %p68_p1 = scmp.eq.s32.totalorder %s67_s22, 0  ;;  %p78_p2 = scmp.eq.s32.totalorder %s613_s19, 0 }
   0xc   : > { %p83_p3 = scmp.ne.s32.totalorder %s605_s17, %s601_s16  ;;  %p84_p4 = scmp.eq.s32.totalorder %s668_s0, 0 }
   0xd   : > { %s684_s23 = scalar_select %p68_p1, %s609_s18, %s70_s21  }
   0xe   : > { %p79_p5 = por %p78_p2, %p77_p0  ;;  %p686_p6 = por %p84_p4, %p83_p3 }
   0xf   : > { %p107_p7 = scmp.eq.s32.totalorder %s668_s0, 4  ;;  %p113_p8 = scmp.eq.s32.totalorder %s436_s1, 4 }
  0x10   : > { %p438_p11 = scmp.ge.s32.totalorder %s613_s19, 5 }
  0x11   : > { %p691_p9 = por %p107_p7, %p77_p0  ;;  %p695_p10 = por %p113_p8, %p83_p3 }
  0x12   : > { %135 = sbr.rel (%p438_p11) target bundleno = 57 (0x39), region = 24 }
  0x13   : > { %s861_s26 = scalar_select %p695_p10, 1, 0 }
  0x17   : > { %138 = sbr.rel (!%p79_p5) target bundleno = 57 (0x39), region = 28  ;;  %s139_s27 = sand.u32 (%p79_p5), 1, %s609_s18  }
  0x18   : > { %s144_s28 = smul.u32 (%p79_p5), 6, %s613_s19  ;;  %s705_s6 = scalar_lea.sflag (%p79_p5), [#allocation5], %s139_s27 }
  0x19   : > { %s454_s29 = smul.u32 (%p79_p5), 48, %s139_s27 }
  0x1a   : > { %s145_s30 = ssub.s32 (%p79_p5), 25, %s144_s28 }
  0x1b   : > { %p146_p12 = scmp.lt.s32.totalorder (%p79_p5), %s145_s30, 6  ;;  %s143_s7 = scalar_lea.vmem (%p79_p5), [#allocation4], %s454_s29 }
  0x1d   : > { %s868_s30 = smov (!%p146_p12, %s145_s30), 6 }
  0x1e   : > { %s702_s4 = sshll.u32 %s868_s30, 7 }
  0x1f   : > { %s150_s5 = ssub.s32 768, %s702_s4 }
  0x20   : > { %151 = vsyncadd %s705_s6, %s150_s5  ;;  %p440_p13 = scmp.ne.s32.totalorder %s702_s4, 0  ;;  %s452_s8 = smul.u32 768, %s613_s19 }
  0x21   : > { %s156_s9 = sshll.u32 %s143_s7, 4  ;;  %s527_s1 = scalar_lea.hbm %s857_s2, 3200  ;;  %s715_s9 = int_to_ptr.vmem [resolvable:$true] %s156_s9 }
  0x22   : > { %s713_s12 = scalar_lea.hbm %s857_s2, %s452_s8 }
  0x23   : > { %s523_s13 = scalar_lea.hbm %s713_s12, %s702_s4  ;;  %p528_p3 = scmp.lt.s32.totalorder %s713_s12, %s857_s2 }
  0x24   : > { %p524_p0 = scmp.ne.s32.totalorder %s713_s12, %s523_s13  ;;  %p529_p4 = scmp.lt.s32.totalorder %s527_s1, %s523_s13 }
  0x26   : > { %p525_p1 = pnand %p524_p0, %p440_p13  ;;  %p530_p5 = por %p529_p4, %p528_p3 }
  0x28   : > { %p526_p2 = pneg %p525_p1 }
  0x2a   : > { %p531_p7 = pnand %p530_p5, %p526_p2 }
  0x2c   : > { %534 = shalt.err (!%p531_p7)
}
  0x2d   : > { %s535_s27 = scalar_lea.vmem %s715_s9, %s702_s4  ;;  %s615_s28 = smov [#allocation4]  }
  0x2e   : > { %p536_p8 = scmp.ne.s32.totalorder %s715_s9, %s535_s27  ;;  %s539_s29 = sshll.u32 %s615_s28, 4  ;;  %s540_s29 = int_to_ptr.vmem [resolvable:$false] %s539_s29 }
  0x2f   : > { %s541_s30 = scalar_lea.vmem %s540_s29, 1536  ;;  %p542_p0 = scmp.lt.s32.totalorder %s715_s9, %s540_s29 }
  0x30   : > { %p537_p11 = pnand %p536_p8, %p440_p13  ;;  %p543_p1 = scmp.lt.s32.totalorder %s541_s30, %s535_s27 }
  0x32   : > { %p538_p12 = pneg %p537_p11  ;;  %p544_p10 = por %p543_p1, %p542_p0 }
  0x34   : > { %p545_p3 = pnand %p544_p10, %p538_p12 }
  0x36   : > { %548 = shalt.err (!%p545_p3)
}
  0x37   : > { %s616_s5 = smov 128   ;;  %s617_s7 = smov 8  }
  0x38   : > { %162 = dma.hbm_to_vmem [thread:$0]  (%p440_p13), %s713_s12, %s702_s4, %s715_s9, %s705_s6, %s616_s5, %s616_s5, %s617_s7  }
  0x39 PF: > { %p444_p2 = scmp.ge.s32.totalorder %s613_s19, 1  ;;  %p164_p4 = scmp.lt.s32.totalorder %s613_s19, 6 }
  0x3b   : > { %p165_p5 = pnand %p444_p2, %p164_p4 }
  0x3c   : > { %s744_s8 = sand.u32 (!%p165_p5), 1, %s605_s17  }
  0x3d   : > { %168 = sbr.rel (%p165_p5) target bundleno = 432 (0x1b0), region = 32  ;;  %s171_s11 = scalar_lea.sflag (!%p165_p5), [#allocation5], %s744_s8 }
  0x3e   : > { %s455_s10 = smul.u32 (!%p165_p5), 48, %s744_s8 }
  0x40   : > { %s174_s13 = scalar_lea.vmem (!%p165_p5), [#allocation4], %s455_s10 }
  0x42   : > { %592 = dma.done.wait (%p686_p6), %s171_s11, 768  }
  0x43   : > { %594 = vsyncadd (%p686_p6), %s171_s11, 4294966528  ;;  %v207_v0 = vld [vmem:[%s174_s13] sm:$0xff]  ;;  %v209_v1 = vld [vmem:[%s174_s13 + $0x10] sm:$0xff]  ;;  %s315_s24 = sld [smem:[#allocation2]]  ;;  %s781_s6 = scalar_lea.vmem [#allocation7], %s455_s10 }
  0x44   : > { %213 = vadd.xlane.f32.xlu0 %v207_v0  ;;  %217 = vadd.xlane.f32.xlu1 %v209_v1  ;;  %v208_v2 = vld [vmem:[%s174_s13 + $0x8] sm:$0xff]  ;;  %v210_v3 = vld [vmem:[%s174_s13 + $0x18] sm:$0xff]  ;;  %v211_v4 = vld [vmem:[%s174_s13 + $0x20] sm:$0xff]  ;;  %s323_s4 = sld [smem:[#allocation3]]  ;;  %s344_s9 = scalar_lea.sflag [#allocation6], %s744_s8 }
  0x45   : > { %v212_v5 = vld [vmem:[%s174_s13 + $0x28] sm:$0xff]  ;;  %s351_s12 = smul.u32 (%p691_p9), 6, %s668_s0 }
  0x47   : > { %s352_s14 = ssub.s32 (%p691_p9), 25, %s351_s12 }
  0x48   : > { %215 = vadd.xlane.f32.xlu0 %v208_v2  ;;  %219 = vadd.xlane.f32.xlu1 %v210_v3  ;;  %p353_p6 = scmp.lt.s32.totalorder (%p691_p9), %s352_s14, 6 }
  0x4c   : > { %221 = vadd.xlane.f32.xlu0 %v211_v4  ;;  %223 = vadd.xlane.f32.xlu1 %v212_v5 }
  0xcd   : > { %v214_v6 = vpop.xlane.xlu0 %213  ;;  %v218_v7 = vpop.xlane.xlu1 %217 }
  0xce   : > { %v225_v8 = vmul.f32 0.0078125, %v214_v6  ;;  %v227_v9 = vmul.f32 0.0078125, %v218_v7 }
  0xd0   : > { %v754_v10 = vsub.f32 %v207_v0, %v225_v8  ;;  %v756_v11 = vsub.f32 %v209_v1, %v227_v9 }
  0xd1   : > { %v216_v12 = vpop.xlane.xlu0 %215  ;;  %v220_v13 = vpop.xlane.xlu1 %219 }
  0xd2   : > { %v226_v14 = vmul.f32 0.0078125, %v216_v12  ;;  %v237_v15 = vmul.f32 %v754_v10, %v754_v10  ;;  %v228_v16 = vmul.f32 0.0078125, %v220_v13  ;;  %v239_v19 = vmul.f32 %v756_v11, %v756_v11 }
  0xd4   : > { %v760_v17 = vsub.f32 %v208_v2, %v226_v14  ;;  %243 = vadd.xlane.f32.xlu0 %v237_v15  ;;  %v762_v18 = vsub.f32 %v210_v3, %v228_v16  ;;  %v316_v16 = vstv %s315_s24 }
  0xd5   : > { %v222_v20 = vpop.xlane.xlu0 %221  ;;  %v224_v21 = vpop.xlane.xlu1 %223 }
  0xd6   : > { %v229_v22 = vmul.f32 0.0078125, %v222_v20  ;;  %v238_v23 = vmul.f32 %v760_v17, %v760_v17  ;;  %v230_v24 = vmul.f32 0.0078125, %v224_v21  ;;  %v240_v27 = vmul.f32 %v762_v18, %v762_v18 }
  0xd7   : > { %v330_v21 = vstv %s323_s4 }
  0xd8   : > { %v768_v25 = vsub.f32 %v211_v4, %v229_v22  ;;  %247 = vadd.xlane.f32.xlu0 %v239_v19  ;;  %245 = vadd.xlane.f32.xlu1 %v238_v23  ;;  %v770_v26 = vsub.f32 %v212_v5, %v230_v24 }
  0xda   : > { %v241_v28 = vmul.f32 %v768_v25, %v768_v25  ;;  %v242_v29 = vmul.f32 %v770_v26, %v770_v26 }
  0xdc   : > { %249 = vadd.xlane.f32.xlu1 %v240_v27  ;;  %251 = vadd.xlane.f32.xlu0 %v241_v28 }
  0xe0   : > { %253 = vadd.xlane.f32.xlu1 %v242_v29 }
 0x15d   : > { %v244_v30 = vpop.xlane.xlu0 %243 }
 0x15e   : > { %v255_v31 = vmul.f32 0.007874016, %v244_v30 }
 0x160   : > { %499 = vrsqrt.f32 %v255_v31  ;;  %vm263_vm0 = vcmp.eq.f32.partialorder %v255_v31, inf  ;;  %v266_v44 = vand.u32 2147483648, %v255_v31  ;;  %vm265_vm1 = vcmp.eq.f32.partialorder %v255_v31, 0.0 }
 0x161   : > { %v246_v32 = vpop.xlane.xlu1 %245  ;;  %v248_v33 = vpop.xlane.xlu0 %247 }
 0x162   : > { %v256_v34 = vmul.f32 0.007874016, %v246_v32  ;;  %v257_v35 = vmul.f32 0.007874016, %v248_v33 }
 0x164   : > { %501 = vrsqrt.f32 %v256_v34  ;;  %vm270_vm2 = vcmp.eq.f32.partialorder %v256_v34, inf  ;;  %vm272_vm3 = vcmp.eq.f32.partialorder %v256_v34, 0.0  ;;  %v273_v51 = vand.u32 2147483648, %v256_v34 }
 0x165   : > { %503 = vrsqrt.f32 %v257_v35  ;;  %v250_v36 = vpop.xlane.xlu1 %249  ;;  %v252_v37 = vpop.xlane.xlu0 %251  ;;  %vm277_vm4 = vcmp.eq.f32.partialorder %v257_v35, inf  ;;  %v280_v54 = vand.u32 2147483648, %v257_v35  ;;  %vm279_vm5 = vcmp.eq.f32.partialorder %v257_v35, 0.0 }
 0x166   : > { %v258_v38 = vmul.f32 0.007874016, %v250_v36  ;;  %v259_v39 = vmul.f32 0.007874016, %v252_v37 }
 0x168   : > { %505 = vrsqrt.f32 %v258_v38  ;;  %vm284_vm6 = vcmp.eq.f32.partialorder %v258_v38, inf  ;;  %vm286_vm7 = vcmp.eq.f32.partialorder %v258_v38, 0.0  ;;  %v287_v63 = vand.u32 2147483648, %v258_v38 }
 0x169   : > { %507 = vrsqrt.f32 %v259_v39  ;;  %v254_v40 = vpop.xlane.xlu1 %253  ;;  %vm291_vm8 = vcmp.eq.f32.partialorder %v259_v39, inf  ;;  %v294_v2 = vand.u32 2147483648, %v259_v39  ;;  %vm293_vm9 = vcmp.eq.f32.partialorder %v259_v39, 0.0 }
 0x16a   : > { %v260_v41 = vmul.f32 0.007874016, %v254_v40 }
 0x16c   : > { %509 = vrsqrt.f32 %v260_v41  ;;  %vm298_vm10 = vcmp.eq.f32.partialorder %v260_v41, inf  ;;  %v301_v12 = vand.u32 2147483648, %v260_v41  ;;  %vm300_vm11 = vcmp.eq.f32.partialorder %v260_v41, 0.0 }
 0x16d   : > { %v500_v42 = vpop.eup %499 }
 0x16e   : > { %v262_v43 = vmul.f32 %v500_v42, %v255_v31 }
 0x170   : > { %v264_v45 = vsel %vm263_vm0, %v255_v31, %v262_v43 }
 0x171   : > { %v502_v46 = vpop.eup %501  ;;  %v267_v47 = vsel %vm265_vm1, %v266_v44, %v264_v45 }
 0x172   : > { %v504_v48 = vpop.eup %503  ;;  %v303_v49 = vadd.f32 1e-06, %v267_v47  ;;  %v269_v50 = vmul.f32 %v502_v46, %v256_v34 }
 0x173   : > { %v276_v52 = vmul.f32 %v504_v48, %v257_v35 }
 0x174   : > { %511 = vrcp.f32 %v303_v49  ;;  %v271_v53 = vsel %vm270_vm2, %v256_v34, %v269_v50 }
 0x175   : > { %v506_v55 = vpop.eup %505  ;;  %v274_v56 = vsel %vm272_vm3, %v273_v51, %v271_v53  ;;  %v278_v57 = vsel %vm277_vm4, %v257_v35, %v276_v52 }
 0x176   : > { %v508_v58 = vpop.eup %507  ;;  %v304_v59 = vadd.f32 1e-06, %v274_v56  ;;  %v281_v60 = vsel %vm279_vm5, %v280_v54, %v278_v57  ;;  %v283_v61 = vmul.f32 %v506_v55, %v258_v38 }
 0x177   : > { %v305_v62 = vadd.f32 1e-06, %v281_v60  ;;  %v290_v0 = vmul.f32 %v508_v58, %v259_v39 }
 0x178   : > { %513 = vrcp.f32 %v304_v59  ;;  %v285_v1 = vsel %vm284_vm6, %v258_v38, %v283_v61 }
 0x179   : > { %v510_v3 = vpop.eup %509  ;;  %515 = vrcp.f32 %v305_v62  ;;  %v288_v4 = vsel %vm286_vm7, %v287_v63, %v285_v1  ;;  %v292_v5 = vsel %vm291_vm8, %v259_v39, %v290_v0 }
 0x17a   : > { %v306_v6 = vadd.f32 1e-06, %v288_v4  ;;  %v295_v7 = vsel %vm293_vm9, %v294_v2, %v292_v5  ;;  %v297_v8 = vmul.f32 %v510_v3, %v260_v41 }
 0x17b   : > { %v307_v9 = vadd.f32 1e-06, %v295_v7 }
 0x17c   : > { %517 = vrcp.f32 %v306_v6  ;;  %v299_v13 = vsel %vm298_vm10, %v260_v41, %v297_v8 }
 0x17d   : > { %519 = vrcp.f32 %v307_v9  ;;  %v302_v14 = vsel %vm300_vm11, %v301_v12, %v299_v13 }
 0x17e   : > { %v308_v15 = vadd.f32 1e-06, %v302_v14 }
 0x180   : > { %521 = vrcp.f32 %v308_v15 }
 0x181   : > { %v512_v19 = vpop.eup %511 }
 0x182   : > { %v317_v20 = vmul.f32 %v512_v19, %v316_v16 }
 0x184   : > { %v324_v22 = vmul.f32 %v317_v20, %v754_v10 }
 0x185   : > { %v514_v23 = vpop.eup %513 }
 0x186   : > { %v516_v24 = vpop.eup %515  ;;  %v331_v27 = vadd.f32 %v330_v21, %v324_v22  ;;  %v318_v28 = vmul.f32 %v514_v23, %v316_v16 }
 0x187   : > { %v319_v29 = vmul.f32 %v516_v24, %v316_v16 }
 0x188   : > { %337 = vst [vmem:[%s781_s6] sm:$0xff] %v331_v27  ;;  %v325_v30 = vmul.f32 %v318_v28, %v760_v17 }
 0x189   : > { %v518_v31 = vpop.eup %517  ;;  %v326_v32 = vmul.f32 %v319_v29, %v756_v11 }
 0x18a   : > { %v520_v10 = vpop.eup %519  ;;  %v332_v33 = vadd.f32 %v330_v21, %v325_v30  ;;  %v320_v34 = vmul.f32 %v518_v31, %v316_v16 }
 0x18b   : > { %v333_v35 = vadd.f32 %v330_v21, %v326_v32  ;;  %v321_v36 = vmul.f32 %v520_v10, %v316_v16 }
 0x18c   : > { %338 = vst [vmem:[%s781_s6 + $0x8] sm:$0xff] %v332_v33  ;;  %v327_v37 = vmul.f32 %v320_v34, %v762_v18 }
 0x18d   : > { %v522_v38 = vpop.eup %521  ;;  %339 = vst [vmem:[%s781_s6 + $0x10] sm:$0xff] %v333_v35  ;;  %v328_v39 = vmul.f32 %v321_v36, %v768_v25 }
 0x18e   : > { %v334_v17 = vadd.f32 %v330_v21, %v327_v37  ;;  %v322_v40 = vmul.f32 %v522_v38, %v316_v16 }
 0x18f   : > { %v335_v41 = vadd.f32 %v330_v21, %v328_v39 }
 0x190   : > { %340 = vst [vmem:[%s781_s6 + $0x18] sm:$0xff] %v334_v17  ;;  %v329_v11 = vmul.f32 %v322_v40, %v770_v26  ;;  %350 = sbr.rel (!%p691_p9) target bundleno = 432 (0x1b0), region = 40 }
 0x191   : > { %341 = vst [vmem:[%s781_s6 + $0x20] sm:$0xff] %v335_v41 }
 0x192   : > { %v336_v42 = vadd.f32 %v330_v21, %v329_v11 }
 0x194   : > { %342 = vst [vmem:[%s781_s6 + $0x28] sm:$0xff] %v336_v42 }
 0x195   : > { %s870_s14 = smov (!%p353_p6, %s352_s14), 6 }
 0x196   : > { %s798_s15 = sshll.u32 %s870_s14, 7 }
 0x197   : > { %s357_s1 = ssub.s32 768, %s798_s15 }
 0x198   : > { %358 = vsyncadd %s344_s9, %s357_s1  ;;  %p446_p10 = scmp.ne.s32.totalorder %s798_s15, 0  ;;  %s453_s25 = smul.u32 768, %s668_s0 }
 0x199   : > { %s363_s21 = sshll.u32 %s781_s6, 4  ;;  %s618_s30 = smov [#allocation7]   ;;  %s811_s21 = int_to_ptr.vmem [resolvable:$true] %s363_s21 }
 0x19a   : > { %s809_s28 = scalar_lea.hbm %s858_s3, %s453_s25  ;;  %s549_s29 = scalar_lea.vmem %s811_s21, %s798_s15 }
 0x19b   : > { %p550_p9 = scmp.ne.s32.totalorder %s811_s21, %s549_s29  ;;  %s553_s5 = sshll.u32 %s618_s30, 4  ;;  %s554_s5 = int_to_ptr.vmem [resolvable:$false] %s553_s5 }
 0x19c   : > { %s555_s0 = scalar_lea.vmem %s554_s5, 1536  ;;  %p556_p8 = scmp.lt.s32.totalorder %s811_s21, %s554_s5 }
 0x19d   : > { %p551_p13 = pnand %p550_p9, %p446_p10  ;;  %p557_p11 = scmp.lt.s32.totalorder %s555_s0, %s549_s29 }
 0x19f   : > { %p552_p7 = pneg %p551_p13  ;;  %p558_p12 = por %p557_p11, %p556_p8 }
 0x1a1   : > { %p559_p0 = pnand %p558_p12, %p552_p7 }
 0x1a3   : > { %562 = shalt.err (!%p559_p0)
}
 0x1a4   : > { %s563_s7 = scalar_lea.hbm %s809_s28, %s798_s15  ;;  %s567_s13 = scalar_lea.hbm %s858_s3, 3200 }
 0x1a5   : > { %p564_p1 = scmp.ne.s32.totalorder %s809_s28, %s563_s7  ;;  %p568_p4 = scmp.lt.s32.totalorder %s809_s28, %s858_s3 }
 0x1a6   : > { %p569_p5 = scmp.lt.s32.totalorder %s567_s13, %s563_s7 }
 0x1a7   : > { %p565_p3 = pnand %p564_p1, %p446_p10 }
 0x1a8   : > { %p570_p6 = por %p569_p5, %p568_p4 }
 0x1a9   : > { %p566_p2 = pneg %p565_p3 }
 0x1ab   : > { %p571_p9 = pnand %p570_p6, %p566_p2 }
 0x1ad   : > { %574 = shalt.err (!%p571_p9)
}
 0x1ae   : > { %s619_s6 = smov 128   ;;  %s620_s12 = smov 8  }
 0x1af   : > { %369 = dma.vmem_to_hbm [thread:$0]  (%p446_p10), %s811_s21, %s798_s15, %s809_s28, %s344_s9, %s619_s6, %s619_s6, %s620_s12  }
 0x1b0 PF: > { %p462_p13 = scmp.ge.s32.totalorder %s613_s19, 2  ;;  %s378_s14 = sand.u32 1, %s601_s16  }
 0x1b1   : > { %p862_p7 = scmp.ne.s32.totalorder %s861_s26, 0  ;;  %s379_s1 = scalar_lea.sflag [#allocation6], %s378_s14 }
 0x1b3   : > { %p459_p8 = pnand %p462_p13, %p862_p7 }
 0x1b5   : > { %p460_p11 = pneg %p459_p8 }
 0x1b7   : > { %596 = dma.done.wait (%p460_p11), %s379_s1, 768  }
 0x1b8   : > { %598 = vsyncadd (%p460_p11), %s379_s1, 4294966528  ;;  %p18_p12 = scmp.ge.s32.totalorder %s672_s20, 7   ;;  %s863_s16 = smov %s605_s17 }
 0x1b9   : > { %s864_s17 = smov %s609_s18  ;;  %s865_s18 = smov %s684_s23 }
 0x1ba   : > { %s866_s19 = smov %s672_s20  ;;  %20 = sbr.rel (!%p18_p12) target bundleno = 8 (0x8), region = 77 }
 0x1bf   :  { %384 = vsyncpa [#allocation5], 1 }
 0x1c0   :  { %386 = vsyncpa [#allocation5 + $0x1], 1 }
 0x1c1   :  { %387 = vsyncpa [#allocation6], 1 }
 0x1c2   :  { %389 = vsyncpa [#allocation6 + $0x1], 1 }

</bundles_post_ra>
